<compile_context>
chip_gen: v5e
topology: v5e:2x2
jax: 0.10.0
libtpu: 0.0.40
codegen_flags: <defaults>
</compile_context>

<pallas_src>
import functools
import math

import jax
import jax.numpy as jnp
from jax.experimental import pallas as pl
from jax.experimental.pallas import tpu as pltpu


def _round_up(n, m):
    return ((n + m - 1) // m) * m


def _sin_pos_emb_kernel(x_ref, tab_ref, out_ref, *, k):
    # x_ref:   (TB, k)    f32  — k timesteps packed per 128-lane output row
    # tab_ref: (k+1, W)   f32  — rows 0..k-1: freqs masked to lane group j,
    #                            row k: phase (0 for sin lanes, pi/2 for cos)
    # out_ref: (TB, W)
    phase = tab_ref[k:k + 1, :]                                   # (1, W)
    if k == 1:
        emb = x_ref[...] * tab_ref[0:1, :]                        # (TB,1)*(1,W)
    else:
        x = x_ref[...]                                            # (TB, k)
        lane = jax.lax.broadcasted_iota(jnp.int32, (1, k), 1)     # (1, k)
        emb = None
        for j in range(k):
            # Extract column j (exact: sum of one value + zeros), broadcast it
            # against the lane-group-masked frequency row.  All terms outside
            # lane group j are exact zeros, so the accumulation is exact.
            xj = jnp.sum(jnp.where(lane == j, x, 0.0), axis=1, keepdims=True)
            term = xj * tab_ref[j:j + 1, :]                       # (TB, W)
            emb = term if emb is None else emb + term
    # cos(t) == sin(t + pi/2); adds one f32 rounding of the argument
    # (~6e-5 abs at |t| ~ 1e3) — fine for diffusion timesteps.
    out_ref[...] = jnp.sin(emb + phase).astype(out_ref.dtype)


def _choose_tile(rows, width, elem_bytes):
    """Batch-tile rows: ~4 MiB per output tile (double-buffered ~8 MiB, fits
    v5e's 16 MiB default scoped VMEM), sublane-aligned, and >=2 grid steps
    when there is enough work so both v7x TensorCores get used."""
    sub = max(8, 32 // elem_bytes)                     # f32: 8, bf16: 16
    cap = max(sub, ((4 << 20) // (width * elem_bytes)) // sub * sub)
    n_steps = max(1, -(-rows // cap))
    if n_steps == 1 and rows > 2 * sub:
        n_steps = 2
    tb = min(cap, _round_up(-(-rows // n_steps), sub))
    return max(sub, tb)


def sinusoidal_pos_emb(x, dim, out_dtype=jnp.float32):
    """x: (B,) timesteps -> (B, 2*(dim//2)) sinusoidal embedding (PyTorch layout)."""
    B = x.shape[0]
    half = dim // 2
    out_dim = 2 * half
    # NOTE: dim == 2 (half == 1) raises ZeroDivisionError — same as the PyTorch source.
    scale = math.log(10000.0) / (half - 1)

    freqs = jnp.exp(jnp.arange(half, dtype=jnp.float32) * jnp.float32(-scale))
    freq_row = jnp.concatenate([freqs, freqs])                        # (out_dim,)
    phase_row = jnp.concatenate(
        [jnp.zeros((half,), jnp.float32),
         jnp.full((half,), 0.5 * math.pi, jnp.float32)])              # (out_dim,)

    # Lane-dense packing: for out_dim < 128 pack k timesteps per 128-lane row.
    k = 128 // out_dim if (out_dim < 128 and 128 % out_dim == 0) else 1
    width = k * out_dim
    # TODO(synk): widths that are not a multiple of 128 (e.g. dim=96, 192) still
    # lower to masked vst; padding lanes + slicing would add an equal-size copy.

    elem_bytes = jnp.dtype(out_dtype).itemsize
    rows = -(-B // k)
    tb = _choose_tile(rows, width, elem_bytes)
    rows_pad = _round_up(rows, tb)
    B_pad = rows_pad * k

    xf = x.astype(jnp.float32)
    if B_pad != B:
        xf = jnp.pad(xf, (0, B_pad - B))
    x_in = xf.reshape(rows_pad, k)                                    # tiny: B*4 bytes

    # Resident (k+1, width) table: row j = freq_row placed in lanes
    # [j*out_dim, (j+1)*out_dim), zeros elsewhere; row k = phase.
    eye_k = jnp.eye(k, dtype=jnp.float32)
    freq_tab = (eye_k[:, :, None] * freq_row[None, None, :]).reshape(k, width)
    phase_tab = jnp.tile(phase_row, k)[None, :]
    tab = jnp.concatenate([freq_tab, phase_tab], axis=0)              # (k+1, width)

    grid = (rows_pad // tb,)
    out = pl.pallas_call(
        functools.partial(_sin_pos_emb_kernel, k=k),
        out_shape=jax.ShapeDtypeStruct((rows_pad, width), out_dtype),
        grid=grid,
        in_specs=[
            pl.BlockSpec((tb, k), lambda i: (i, 0)),
            pl.BlockSpec((k + 1, width), lambda i: (0, 0)),   # resident table
        ],
        out_specs=pl.BlockSpec((tb, width), lambda i: (i, 0)),
        compiler_params=pltpu.CompilerParams(
            dimension_semantics=("parallel",)),
    )(x_in, tab)

    # Row-major (rows_pad, k*out_dim) -> (B_pad, out_dim) is a free view.
    out = out.reshape(B_pad, out_dim)
    if B_pad != B:
        out = out[:B]
    return out


def _reference(x, dim):
    half = dim // 2
    scale = math.log(10000.0) / (half - 1)
    freqs = jnp.exp(jnp.arange(half, dtype=jnp.float32) * -scale)
    emb = x.astype(jnp.float32)[:, None] * freqs[None, :]
    return jnp.concatenate([jnp.sin(emb), jnp.cos(emb)], axis=-1)


if __name__ == "__main__":
    emb_fn = jax.jit(sinusoidal_pos_emb, static_argnames=("dim",))

    # Case 1: narrow dim -> lane-dense packed path (k = 4 timesteps per row).
    B, dim = 32, 32
    x = jax.random.uniform(jax.random.PRNGKey(0), (B,), dtype=jnp.float32,
                           minval=0.0, maxval=1000.0)
    out = jax.block_until_ready(emb_fn(x, dim))
    ref = _reference(x, dim)
    assert out.shape == ref.shape == (B, dim) and out.dtype == jnp.float32
    # cos(t) = sin(t + pi/2): for |t| ~ 1e3 the f32 phase add contributes up to
    # ~6e-5 absolute error, hence atol=1e-4.
    assert jnp.allclose(out, ref, atol=1e-4, rtol=1e-5)

    # Case 2: wide dim -> unpacked path (k = 1, 256 dense lanes).
    B2, dim2 = 16, 256
    x2 = jax.random.uniform(jax.random.PRNGKey(1), (B2,), dtype=jnp.float32,
                            minval=0.0, maxval=1000.0)
    out2 = jax.block_until_ready(emb_fn(x2, dim2))
    ref2 = _reference(x2, dim2)
    assert out2.shape == ref2.shape
    assert jnp.allclose(out2, ref2, atol=1e-4, rtol=1e-5)

    # Case 3: batch not divisible by packing/tile -> pad + slice path.
    B3, dim3 = 10, 64
    x3 = jax.random.uniform(jax.random.PRNGKey(2), (B3,), dtype=jnp.float32,
                            minval=0.0, maxval=1000.0)
    out3 = jax.block_until_ready(emb_fn(x3, dim3))
    ref3 = _reference(x3, dim3)
    assert out3.shape == ref3.shape
    assert jnp.allclose(out3, ref3, atol=1e-4, rtol=1e-5)

    print("KERNEL_OK")
</pallas_src>

<mosaic_0001>
module attributes {stable_mosaic.version = 11 : i64} {
  func.func @_sin_pos_emb_kernel(%arg0: i32, %arg1: memref<8x4xf32, #tpu.memory_space<vmem>>, %arg2: memref<5x128xf32, #tpu.memory_space<vmem>>, %arg3: memref<8x128xf32, #tpu.memory_space<vmem>>) attributes {dimension_semantics = [#tpu.dimension_semantics<parallel>], iteration_bounds = array<i64: 1>, scalar_prefetch = 0 : i64, scratch_operands = 0 : i64, tpu.core_type = #tpu.core_type<tc>, window_params = [{transform_indices = @transform_0, window_bounds = array<i64: 8, 4>}, {pipeline_mode = #tpu.pipeline_mode<synchronous>, transform_indices = @transform_1, window_bounds = array<i64: 5, 128>}, {transform_indices = @transform_2, window_bounds = array<i64: 8, 128>}]} {
    %c4 = arith.constant 4 : index
    %c0 = arith.constant 0 : index
    %0 = vector.load %arg2[%c4, %c0] : memref<5x128xf32, #tpu.memory_space<vmem>>, vector<1x128xf32>
    %c0_0 = arith.constant 0 : index
    %c0_1 = arith.constant 0 : index
    %1 = vector.load %arg1[%c0_0, %c0_1] : memref<8x4xf32, #tpu.memory_space<vmem>>, vector<8x4xf32>
    %2 = tpu.iota {dimensions = array<i32: 1>} : vector<1x4xi32>
    %c0_i32 = arith.constant 0 : i32
    %3 = vector.broadcast %c0_i32 : i32 to vector<1x4xi32>
    %4 = arith.cmpi eq, %2, %3 : vector<1x4xi32>
    %cst = arith.constant 0.000000e+00 : f32
    %5 = vector.shape_cast %4 : vector<1x4xi1> to vector<1x4xi1>
    %6 = vector.broadcast %5 : vector<1x4xi1> to vector<8x4xi1>
    %7 = vector.broadcast %cst : f32 to vector<8x4xf32>
    %8 = arith.select %6, %1, %7 : vector<8x4xi1>, vector<8x4xf32>
    %cst_2 = arith.constant dense<0.000000e+00> : vector<8xf32>
    %9 = vector.multi_reduction <add>, %8, %cst_2 [1] : vector<8x4xf32> to vector<8xf32>
    %10 = vector.shape_cast %9 : vector<8xf32> to vector<8x1xf32>
    %c0_3 = arith.constant 0 : index
    %c0_4 = arith.constant 0 : index
    %11 = vector.load %arg2[%c0_3, %c0_4] : memref<5x128xf32, #tpu.memory_space<vmem>>, vector<1x128xf32>
    %12 = vector.broadcast %10 : vector<8x1xf32> to vector<8x128xf32>
    %13 = vector.broadcast %11 : vector<1x128xf32> to vector<8x128xf32>
    %14 = arith.mulf %12, %13 : vector<8x128xf32>
    %c1_i32 = arith.constant 1 : i32
    %15 = vector.broadcast %c1_i32 : i32 to vector<1x4xi32>
    %16 = arith.cmpi eq, %2, %15 : vector<1x4xi32>
    %cst_5 = arith.constant 0.000000e+00 : f32
    %17 = vector.shape_cast %16 : vector<1x4xi1> to vector<1x4xi1>
    %18 = vector.broadcast %17 : vector<1x4xi1> to vector<8x4xi1>
    %19 = vector.broadcast %cst_5 : f32 to vector<8x4xf32>
    %20 = arith.select %18, %1, %19 : vector<8x4xi1>, vector<8x4xf32>
    %cst_6 = arith.constant dense<0.000000e+00> : vector<8xf32>
    %21 = vector.multi_reduction <add>, %20, %cst_6 [1] : vector<8x4xf32> to vector<8xf32>
    %22 = vector.shape_cast %21 : vector<8xf32> to vector<8x1xf32>
    %c1 = arith.constant 1 : index
    %c0_7 = arith.constant 0 : index
    %23 = vector.load %arg2[%c1, %c0_7] : memref<5x128xf32, #tpu.memory_space<vmem>>, vector<1x128xf32>
    %24 = vector.broadcast %22 : vector<8x1xf32> to vector<8x128xf32>
    %25 = vector.broadcast %23 : vector<1x128xf32> to vector<8x128xf32>
    %26 = arith.mulf %24, %25 : vector<8x128xf32>
    %27 = arith.addf %14, %26 : vector<8x128xf32>
    %c2_i32 = arith.constant 2 : i32
    %28 = vector.broadcast %c2_i32 : i32 to vector<1x4xi32>
    %29 = arith.cmpi eq, %2, %28 : vector<1x4xi32>
    %cst_8 = arith.constant 0.000000e+00 : f32
    %30 = vector.shape_cast %29 : vector<1x4xi1> to vector<1x4xi1>
    %31 = vector.broadcast %30 : vector<1x4xi1> to vector<8x4xi1>
    %32 = vector.broadcast %cst_8 : f32 to vector<8x4xf32>
    %33 = arith.select %31, %1, %32 : vector<8x4xi1>, vector<8x4xf32>
    %cst_9 = arith.constant dense<0.000000e+00> : vector<8xf32>
    %34 = vector.multi_reduction <add>, %33, %cst_9 [1] : vector<8x4xf32> to vector<8xf32>
    %35 = vector.shape_cast %34 : vector<8xf32> to vector<8x1xf32>
    %c2 = arith.constant 2 : index
    %c0_10 = arith.constant 0 : index
    %36 = vector.load %arg2[%c2, %c0_10] : memref<5x128xf32, #tpu.memory_space<vmem>>, vector<1x128xf32>
    %37 = vector.broadcast %35 : vector<8x1xf32> to vector<8x128xf32>
    %38 = vector.broadcast %36 : vector<1x128xf32> to vector<8x128xf32>
    %39 = arith.mulf %37, %38 : vector<8x128xf32>
    %40 = arith.addf %27, %39 : vector<8x128xf32>
    %c3_i32 = arith.constant 3 : i32
    %41 = vector.broadcast %c3_i32 : i32 to vector<1x4xi32>
    %42 = arith.cmpi eq, %2, %41 : vector<1x4xi32>
    %cst_11 = arith.constant 0.000000e+00 : f32
    %43 = vector.shape_cast %42 : vector<1x4xi1> to vector<1x4xi1>
    %44 = vector.broadcast %43 : vector<1x4xi1> to vector<8x4xi1>
    %45 = vector.broadcast %cst_11 : f32 to vector<8x4xf32>
    %46 = arith.select %44, %1, %45 : vector<8x4xi1>, vector<8x4xf32>
    %cst_12 = arith.constant dense<0.000000e+00> : vector<8xf32>
    %47 = vector.multi_reduction <add>, %46, %cst_12 [1] : vector<8x4xf32> to vector<8xf32>
    %48 = vector.shape_cast %47 : vector<8xf32> to vector<8x1xf32>
    %c3 = arith.constant 3 : index
    %c0_13 = arith.constant 0 : index
    %49 = vector.load %arg2[%c3, %c0_13] : memref<5x128xf32, #tpu.memory_space<vmem>>, vector<1x128xf32>
    %50 = vector.broadcast %48 : vector<8x1xf32> to vector<8x128xf32>
    %51 = vector.broadcast %49 : vector<1x128xf32> to vector<8x128xf32>
    %52 = arith.mulf %50, %51 : vector<8x128xf32>
    %53 = arith.addf %40, %52 : vector<8x128xf32>
    %54 = vector.broadcast %0 : vector<1x128xf32> to vector<8x128xf32>
    %55 = arith.addf %53, %54 : vector<8x128xf32>
    %56 = math.sin %55 : vector<8x128xf32>
    %c0_14 = arith.constant 0 : index
    %c0_15 = arith.constant 0 : index
    %57 = vector.load %arg3[%c0_14, %c0_15] : memref<8x128xf32, #tpu.memory_space<vmem>>, vector<8x128xf32>
    tpu.vector_store %arg3[%c0_14, %c0_15], %56 {strides = array<i32>} : memref<8x128xf32, #tpu.memory_space<vmem>>, vector<8x128xf32>,
    return
  }
  func.func @transform_0(%arg0: i32) -> (i32, i32) {
    %c0_i32 = arith.constant 0 : i32
    %c0_i32_0 = arith.constant 0 : i32
    return %arg0, %c0_i32 : i32, i32
  }
  func.func @transform_1(%arg0: i32) -> (i32, i32) {
    %c0_i32 = arith.constant 0 : i32
    %c0_i32_0 = arith.constant 0 : i32
    %c0_i32_1 = arith.constant 0 : i32
    return %c0_i32, %c0_i32_0 : i32, i32
  }
  func.func @transform_2(%arg0: i32) -> (i32, i32) {
    %c0_i32 = arith.constant 0 : i32
    %c0_i32_0 = arith.constant 0 : i32
    return %arg0, %c0_i32 : i32, i32
  }
}

</mosaic_0001>

<bundles_post_ra>
// kernel: tile.7
= control target key start
LH: loop header
LB: loop body
LE: loop exit
PB: predicated region body
PF: predicated region fallthrough
CT: control target
= control target key end

     0   :  { %s37_s8 = smov 32   ;;  %s38_s9 = smov 64   ;;  %vm7_vm0 = vcmask 261120   ;;  %vm13_vm1 = vcmask 1048320   ;;  %vm19_vm2 = vcmask 785920   ;;  %vm25_vm3 = vcmask 523520   ;;  %s55_s0 = inlined_call_operand.vmem [shape: f32[4,32], index: 0, kind: input, shape index: {}]   ;;  %s56_s1 = inlined_call_operand.vmem [shape: f32[1,128], index: 1, kind: output, shape index: {}]  }
   0x1   :  { %v4_v0 = vld [vmem:[%s55_s0] sm:$0xf]  ;;  %s36_s0 = smov 96  }
   0x2   :  { %5 = vst [vmem:[#allocation1] sm:$0xf] %v4_v0 }
   0x9   :  { %v10_v1 = vld [vmem:[#allocation1 + $0x3] sm:$0x1]   ;;  %v22_v2 = vld [vmem:[#allocation1 + $0x1] sm:$0x1]   ;;  %v16_v3 = vld [vmem:[#allocation1 + $0x2] sm:$0x1]  }
   0xa   :  { %11 = vrot.lane.b32.xlu0 %v10_v1, %s36_s0  ;;  %23 = vrot.lane.b32.xlu1 %v22_v2, %s37_s8  ;;  %v6_v4 = vld [vmem:[#allocation1] sm:$0x1]  }
   0xb   :  { %8 = vst.msk [vmem:[#allocation0] sm:$0x1] %vm7_vm0, %v6_v4  }
  0x12   :  { %17 = vrot.lane.b32.xlu0 %v16_v3, %s38_s9 }
  0x7c   :  { %v12_v5 = vpop.permute.xlu0 %11   ;;  %v24_v6 = vpop.permute.xlu1 %23  }
  0x7d   :  { %14 = vst.msk [vmem:[#allocation0] sm:$0x1] %vm13_vm1, %v12_v5  }
  0x84   :  { %v18_v7 = vpop.permute.xlu0 %17  }
  0x85   :  { %20 = vst.msk [vmem:[#allocation0] sm:$0x1] %vm19_vm2, %v18_v7  }
  0x86   :  { %26 = vst.msk [vmem:[#allocation0] sm:$0x1] %vm25_vm3, %v24_v6  }
  0x8d   :  { %v29_v8 = vld [vmem:[#allocation0] sm:$0x1] }
  0x8e   :  { %32 = vst [vmem:[%s56_s1] sm:$0x1] %v29_v8 }

// kernel: sinusoidal_pos_emb.1
= control target key start
LH: loop header
LB: loop body
LE: loop exit
PB: predicated region body
PF: predicated region fallthrough
CT: control target
= control target key end

     0   :  { %v13_v0 = vlaneseq  ;;  %vm19_vm0 = vcmask 31744   ;;  %v236_v39 = vmov 683565275   ;;  %v237_v41 = vmov 2475754826   ;;  %s335_s0 = inlined_call_operand.vmem [shape: f32[8,4], index: 0, kind: input, shape index: {}]   ;;  %s336_s1 = inlined_call_operand.vmem [shape: f32[5,128], index: 1, kind: input, shape index: {}]   ;;  %s337_s2 = inlined_call_operand.vmem [shape: f32[8,128], index: 2, kind: output, shape index: {}]  }
   0x1   :  { %v12_v1 = vld [vmem:[%s335_s0] sm:$0xff]  ;;  %v238_v44 = vmov 2131351028   ;;  %v239_v47 = vmov 2102212464  }
   0x2   :  { %v14_v2 = vand.u32 127, %v13_v0  ;;  %v231_v13 = vld [vmem:[%s336_s1] ss:$0 sm:$0xff]  ;;  %v233_v14 = vld [vmem:[%s336_s1 + $0x1] ss:$0 sm:$0xff] }
   0x3   :  { %v232_v15 = vld [vmem:[%s336_s1 + $0x2] ss:$0 sm:$0xff]  ;;  %v234_v16 = vld [vmem:[%s336_s1 + $0x3] ss:$0 sm:$0xff]  ;;  %v235_v24 = vld [vmem:[%s336_s1 + $0x4] ss:$0 sm:$0xff] }
   0x4   :  { %vm15_vm1 = vcmp.eq.s32.totalorder %v14_v2, 0  ;;  %vm37_vm2 = vcmp.eq.s32.totalorder %v14_v2, 2  ;;  %vm26_vm3 = vcmp.eq.s32.totalorder %v14_v2, 1  ;;  %vm48_vm4 = vcmp.eq.s32.totalorder %v14_v2, 3 }
   0x5   :  { %v18_v3 = vsel %vm15_vm1, %v12_v1, 0.0  ;;  %v40_v4 = vsel %vm37_vm2, %v12_v1, 0.0  ;;  %v29_v7 = vsel %vm26_vm3, %v12_v1, 0.0  ;;  %v51_v8 = vsel %vm48_vm4, %v12_v1, 0.0 }
   0x6   :  { %v20_v5 = vsel %vm19_vm0, %v18_v3, 0.0  ;;  %v41_v6 = vsel %vm19_vm0, %v40_v4, 0.0  ;;  %v30_v9 = vsel %vm19_vm0, %v29_v7, 0.0  ;;  %v52_v10 = vsel %vm19_vm0, %v51_v8, 0.0 }
   0x7   :  { %21 = vadd.xlane.f32.xlu0 %v20_v5  ;;  %42 = vadd.xlane.f32.xlu1 %v41_v6  ;;  %v240_v50 = vmov 920167782   ;;  %v241_v53 = vmov 1326507024  }
   0xf   :  { %31 = vadd.xlane.f32.xlu0 %v30_v9  ;;  %53 = vadd.xlane.f32.xlu1 %v52_v10 }
  0x7a   :  { %v22_v11 = vpop.xlane.xlu0 %21  ;;  %v43_v12 = vpop.xlane.xlu1 %42 }
  0x7b   :  { %v25_v19 = vmul.f32 %v231_v13, %v22_v11  ;;  %v46_v21 = vmul.f32 %v232_v15, %v43_v12 }
  0x82   :  { %v32_v17 = vpop.xlane.xlu0 %31  ;;  %v54_v18 = vpop.xlane.xlu1 %53 }
  0x83   :  { %v35_v20 = vmul.f32 %v233_v14, %v32_v17  ;;  %v57_v23 = vmul.f32 %v234_v16, %v54_v18 }
  0x85   :  { %v36_v22 = vadd.f32 %v35_v20, %v25_v19 }
  0x87   :  { %v47_v25 = vadd.f32 %v46_v21, %v36_v22 }
  0x89   :  { %v58_v26 = vadd.f32 %v57_v23, %v47_v25  ;;  %v242_v23 = vmov 0  }
  0x8b   :  { %v276_v27 = vadd.f32 %v235_v24, %v58_v26 }
  0x8d   :  { %v64_v28 = vand.u32 2139095040, %v276_v27  ;;  %v61_v31 = vand.u32 2147483647, %v276_v27  ;;  %vm63_vm1 = vcmp.lt.s32.totalorder %v276_v27, 0 }
  0x8f   :  { %v65_v29 = vshrl.u32 %v64_v28, 23  ;;  %v68_v33 = vand.u32 8388607, %v61_v31  ;;  %vm62_vm2 = vcmp.le.f32.partialorder %v61_v31, 0.7853982 }
  0x91   :  { %v221_v30 = vadd.s32 4294967169, %v65_v29  ;;  %v69_v37 = vor.u32 8388608, %v68_v33 }
  0x93   :  { %v71_v32 = vadd.s32 1, %v221_v30  ;;  %v293_v60 = vshll.u32 %v69_v37, 8 }
  0x95   :  { %vm72_vm5 = vcmp.gt.s32.totalorder %v71_v32, 0  ;;  %v110_v5 = vand.u32 65535, %v293_v60  ;;  %v111_v6 = vshrl.u32 %v293_v60, 16 }
  0x96   :  { %v73_v34 = vsel %vm72_vm5, %v71_v32, 0 }
  0x97   :  { %v75_v35 = vand.u32 31, %v73_v34  ;;  %v284_v38 = vshrl.u32 %v73_v34, 5 }
  0x99   :  { %v282_v36 = vsub.s32 32, %v75_v35  ;;  %v78_v40 = vshll.u32 %v236_v39, %v75_v35  ;;  %v81_v42 = vshll.u32 %v237_v41, %v75_v35  ;;  %v84_v46 = vshll.u32 %v238_v44, %v75_v35 }
  0x9a   :  { %v87_v49 = vshll.u32 %v239_v47, %v75_v35  ;;  %v90_v52 = vshll.u32 %v240_v50, %v75_v35  ;;  %vm93_vm6 = vcmp.lt.s32.totalorder %v284_v38, 1  ;;  %vm96_vm7 = vcmp.lt.s32.totalorder %v284_v38, 4 }
  0x9b   :  { %v79_v43 = vshrl.u32 %v237_v41, %v282_v36  ;;  %v82_v45 = vshrl.u32 %v238_v44, %v282_v36  ;;  %v85_v48 = vshrl.u32 %v239_v47, %v282_v36  ;;  %v88_v51 = vshrl.u32 %v240_v50, %v282_v36 }
  0x9c   :  { %v91_v54 = vshrl.u32 %v241_v53, %v282_v36  ;;  %vm95_vm8 = vcmp.lt.s32.totalorder %v284_v38, 3  ;;  %vm94_vm9 = vcmp.lt.s32.totalorder %v284_v38, 2  ;;  %v77_v34 = vshrl.u32 %v236_v39, %v282_v36 }
  0x9d   :  { %v80_v55 = vor.u32 %v79_v43, %v78_v40  ;;  %v83_v56 = vor.u32 %v82_v45, %v81_v42  ;;  %v86_v57 = vor.u32 %v85_v48, %v84_v46  ;;  %v89_v58 = vor.u32 %v88_v51, %v87_v49 }
  0x9e   :  { %v92_v59 = vor.u32 %v91_v54, %v90_v52 }
  0x9f   :  { %v101_v61 = vsel %vm93_vm6, %v80_v55, %v83_v56  ;;  %v105_v62 = vsel %vm93_vm6, %v83_v56, %v86_v57  ;;  %v102_v63 = vsel %vm96_vm7, %v89_v58, 920167782  ;;  %v98_v30 = vsel %vm96_vm7, %v86_v57, 2102212464 }
  0xa0   :  { %v106_v0 = vsel %vm96_vm7, %v92_v59, 1326507024  ;;  %v103_v1 = vsel %vm95_vm8, %v86_v57, %v102_v63  ;;  %v97_v43 = vsel %vm93_vm6, %v77_v34, %v80_v55  ;;  %v99_v44 = vsel %vm95_vm8, %v83_v56, %v98_v30 }
  0xa1   :  { %v107_v2 = vsel %vm95_vm8, %v89_v58, %v106_v0  ;;  %v104_v3 = vsel %vm94_vm9, %v101_v61, %v103_v1  ;;  %v100_v36 = vsel %vm94_vm9, %v97_v43, %v99_v44  ;;  %vm204_vm6 = vweird.f32 %v276_v27 }
  0xa2   :  { %v108_v4 = vsel %vm94_vm9, %v105_v62, %v107_v2  ;;  %v134_v9 = vand.u32 65535, %v104_v3  ;;  %v135_v10 = vshrl.u32 %v104_v3, 16  ;;  %v154_v52 = vmul.u32 %v293_v60, %v100_v36 }
  0xa3   :  { %v112_v7 = vand.u32 65535, %v108_v4  ;;  %v113_v8 = vshrl.u32 %v108_v4, 16 }
  0xa4   :  { %v137_v13 = vmul.u32 %v135_v10, %v110_v5  ;;  %v138_v14 = vmul.u32 %v134_v9, %v111_v6  ;;  %v136_v18 = vmul.u32 %v134_v9, %v110_v5  ;;  %v139_v22 = vmul.u32 %v135_v10, %v111_v6 }
  0xa5   :  { %v115_v11 = vmul.u32 %v113_v8, %v110_v5  ;;  %v116_v12 = vmul.u32 %v112_v7, %v111_v6  ;;  %v114_v15 = vmul.u32 %v112_v7, %v110_v5  ;;  %v117_v17 = vmul.u32 %v113_v8, %v111_v6 }
  0xa6   :  { %v140_v19 = vshll.u32 %v137_v13, 16  ;;  %v142_v25 = vshll.u32 %v138_v14, 16  ;;  %v141_v41 = vshrl.u32 %v137_v13, 16  ;;  %v143_v47 = vshrl.u32 %v138_v14, 16 }
  0xa7   :  { %v118_v16 = vshll.u32 %v115_v11, 16  ;;  %v120_v20 = vshll.u32 %v116_v12, 16  ;;  %v119_v35 = vshrl.u32 %v115_v11, 16  ;;  %v121_v45 = vshrl.u32 %v116_v12, 16 }
  0xa8   :  { %vm144_vm11 = vc.u32 %v136_v18, %v140_v19  ;;  %v146_v26 = vadd.s32 %v140_v19, %v136_v18 }
  0xa9   :  { %vm122_vm10 = vc.u32 %v114_v15, %v118_v16  ;;  %v124_v21 = vadd.s32 %v118_v16, %v114_v15  ;;  %v145_v29 = vsel %vm144_vm11, 1, %v242_v23 }
  0xaa   :  { %v123_v24 = vsel %vm122_vm10, 1, %v242_v23  ;;  %v147_v33 = vadd.s32 %v145_v29, %v139_v22  ;;  %vm148_vm13 = vc.u32 %v146_v26, %v142_v25  ;;  %v150_v50 = vadd.s32 %v146_v26, %v142_v25 }
  0xab   :  { %v125_v28 = vadd.s32 %v123_v24, %v117_v17  ;;  %vm126_vm12 = vc.u32 %v124_v21, %v120_v20  ;;  %v149_v40 = vsel %vm148_vm13, 1, %v242_v23 }
  0xac   :  { %v127_v32 = vsel %vm126_vm12, 1, %v242_v23  ;;  %v151_v42 = vadd.s32 %v149_v40, %v147_v33 }
  0xad   :  { %v129_v37 = vadd.s32 %v127_v32, %v125_v28 }
  0xae   :  { %v152_v48 = vadd.s32 %v151_v42, %v141_v41 }
  0xaf   :  { %v130_v46 = vadd.s32 %v129_v37, %v119_v35 }
  0xb0   :  { %v153_v39 = vadd.s32 %v152_v48, %v143_v47 }
  0xb1   :  { %v131_v49 = vadd.s32 %v130_v46, %v121_v45 }
  0xb2   :  { %v157_v51 = vadd.s32 1, %v153_v39 }
  0xb3   :  { %vm156_vm14 = vc.u32 %v131_v49, %v150_v50  ;;  %v155_v38 = vadd.s32 %v150_v50, %v131_v49 }
  0xb4   :  { %v158_v53 = vsel %vm156_vm14, %v157_v51, %v153_v39 }
  0xb5   :  { %v159_v54 = vadd.s32 %v158_v53, %v154_v52 }
  0xb7   :  { %v160_v55 = vadd.s32 536870912, %v159_v54 }
  0xb9   :  { %v161_v57 = vshrl.u32 %v160_v55, 30 }
  0xbb   :  { %v162_v58 = vshll.u32 %v161_v57, 30  ;;  %v185_v13 = vsub.s32 4, %v161_v57 }
  0xbd   :  { %v163_v56 = vsub.s32 %v159_v54, %v162_v58  ;;  %v186_v18 = vsel %vm63_vm1, %v185_v13, %v161_v57 }
  0xbe   :  { %v188_v21 = vsel %vm62_vm2, 0, %v186_v18 }
  0xbf   :  { %vm164_vm15 = vcmp.lt.s32.totalorder %v163_v56, 0  ;;  %v165_v59 = vsub.s32 0, %v163_v56  ;;  %v205_v26 = vadd.s32 3, %v188_v21 }
  0xc1   :  { %v166_v61 = vsel %vm164_vm15, %v165_v59, %v163_v56  ;;  %v206_v32 = vand.u32 3, %v205_v26 }
  0xc2   :  { %v167_v62 = vclz %v166_v61 }
  0xc3   :  { %vm208_vm3 = vcmp.eq.s32.totalorder %v206_v32, 0  ;;  %vm211_vm4 = vcmp.eq.s32.totalorder %v206_v32, 2  ;;  %vm207_vm5 = vcmp.lt.s32.totalorder %v206_v32, 2 }
  0xc4   :  { %v222_v63 = vadd.s32 4294967294, %v167_v62 }
  0xc6   :  { %vm223_vm0 = vcmp.lt.s32.totalorder %v222_v63, 0 }
  0xc7   :  { %v170_v0 = vsel %vm223_vm0, 0, %v222_v63 }
  0xc8   :  { %v171_v1 = vsub.s32 32, %v170_v0  ;;  %v175_v2 = vsub.s32 4294967266, %v170_v0  ;;  %v172_v3 = vshll.u32 %v163_v56, %v170_v0 }
  0xca   :  { %v173_v4 = vshrl.u32 %v155_v38, %v171_v1  ;;  %v176_v5 = vadd.s32 127, %v175_v2 }
  0xcc   :  { %v174_v60 = vor.u32 %v173_v4, %v172_v3  ;;  %v177_v6 = vshll.u32 %v176_v5, 23 }
  0xce   :  { %v178_v7 = vor.u32 4788187, %v177_v6  ;;  %v181_v9 = vcvt.s32.f32 %v174_v60 }
  0xd0   :  { %v179_v8 = vand.u32 2147483647, %v178_v7 }
  0xd2   :  { %v182_v10 = vmul.f32 %v181_v9, %v179_v8 }
  0xd4   :  { %v183_v11 = vxor.u32 2147483648, %v182_v10 }
  0xd6   :  { %v184_v12 = vsel %vm63_vm1, %v183_v11, %v182_v10 }
  0xd7   :  { %v187_v14 = vsel %vm62_vm2, %v276_v27, %v184_v12 }
  0xd8   :  { %v189_v15 = vmul.f32 %v187_v14, %v187_v14 }
  0xda   :  { %v190_v16 = vmul.f32 -0.001358992, %v189_v15  ;;  %v197_v17 = vmul.f32 -0.00019511016, %v189_v15 }
  0xdc   :  { %v191_v19 = vadd.f32 0.041655596, %v190_v16  ;;  %v198_v20 = vadd.f32 0.008332121, %v197_v17 }
  0xde   :  { %v192_v22 = vmul.f32 %v191_v19, %v189_v15  ;;  %v199_v23 = vmul.f32 %v198_v20, %v189_v15 }
  0xe0   :  { %v193_v24 = vadd.f32 -0.4999988, %v192_v22  ;;  %v200_v25 = vadd.f32 -0.16666654, %v199_v23 }
  0xe2   :  { %v194_v28 = vmul.f32 %v193_v24, %v189_v15  ;;  %v201_v29 = vmul.f32 %v200_v25, %v189_v15 }
  0xe4   :  { %v195_v30 = vadd.f32 1.0, %v194_v28  ;;  %v202_v31 = vadd.f32 1.0, %v201_v29 }
  0xe6   :  { %v203_v33 = vmul.f32 %v202_v31, %v187_v14  ;;  %v212_v34 = vxor.u32 2147483648, %v195_v30 }
  0xe8   :  { %v209_v35 = vxor.u32 2147483648, %v203_v33  ;;  %v213_v40 = vsel %vm211_vm4, %v212_v34, %v203_v33 }
  0xea   :  { %v210_v37 = vsel %vm208_vm3, %v195_v30, %v209_v35 }
  0xeb   :  { %v214_v41 = vsel %vm207_vm5, %v210_v37, %v213_v40 }
  0xec   :  { %v215_v42 = vsel %vm204_vm6, nan, %v214_v41 }
  0xed   :  { %216 = vst [vmem:[%s337_s2] sm:$0xff] %v215_v42 }

</bundles_post_ra>
